<compile_context>
chip_gen: v5e
topology: v5e:2x2
jax: 0.10.0
libtpu: 0.0.40
codegen_flags: <defaults>
</compile_context>

<pallas_src>
import jax
import jax.numpy as jnp
from jax import lax
from jax.experimental import pallas as pl
from jax.experimental.pallas import tpu as pltpu

GVP_EPS = 1e-8   # eps of the GVP LayerNorm module (vector branch)
LN_EPS = 1e-5    # eps of the scalar nn.LayerNorm


def _gvp_layernorm_kernel(s_ref, v_ref, gamma_ref, beta_ref, s_out_ref, v_out_ref):
    # ---------------- scalar LayerNorm (reduce over S; N on lanes) ----------------
    s = s_ref[...].astype(jnp.float32)                       # (S, TN)
    mean = jnp.mean(s, axis=0, keepdims=True)                # (1, TN)
    centered = s - mean
    var = jnp.mean(centered * centered, axis=0, keepdims=True)
    s_norm = centered * lax.rsqrt(var + LN_EPS)              # EUP rsqrt, VPU multiply
    gamma = gamma_ref[...].astype(jnp.float32)               # (S, 1) -> lane broadcast
    beta = beta_ref[...].astype(jnp.float32)                 # (S, 1)
    s_out_ref[...] = (s_norm * gamma + beta).astype(s_out_ref.dtype)

    # ---------------- vector norm branch (xyz leading; N on lanes) ----------------
    v = v_ref[...].astype(jnp.float32)                       # (3, Vn, TN)
    vsq = v * v
    # squared L2 norm over xyz: pure VPU adds across vreg slabs (no XLU lane reduce)
    vn = vsq[0] + vsq[1] + vsq[2] + GVP_EPS                  # (Vn, TN)
    mask = (vn > 2.0 * GVP_EPS).astype(jnp.float32)          # (Vn, TN)
    num = jnp.sum(vn * mask, axis=0, keepdims=True)          # (1, TN) tiny sublane reduce
    den = GVP_EPS + jnp.sum(mask, axis=0, keepdims=True)     # (1, TN)
    # exact divide on the tiny (1, TN) slab, then EUP rsqrt; the big (3, Vn, TN)
    # array only sees a multiply (replaces the original full-size divide).
    inv_vn = lax.rsqrt(num / den + GVP_EPS)                  # (1, TN)
    scale = (mask * inv_vn)[None, :, :]                      # (1, Vn, TN)
    v_out_ref[...] = (v * scale).astype(v_out_ref.dtype)


def _pick_tile_n(N, S, Vn, vmem_budget_bytes=12 * 1024 * 1024):
    """Largest lane tile (multiple of 128) whose double-buffered in+out fits budget."""
    if N <= 128:
        return N   # single block; "block dim == full array dim" satisfies lane rule
    bytes_per_col = 2 * 2 * 4 * (S + 3 * Vn)   # double-buffer * (in+out) * f32
    max_cols = max(128, vmem_budget_bytes // bytes_per_col)
    tile = min(2048, max_cols, N)
    tile = max(128, (tile // 128) * 128)
    # keep >= ~8 grid steps when N allows so megacore (v7x, 2 TCs) has work to shard
    if N >= 8 * 128:
        tile = min(tile, max(128, ((N // 8) // 128) * 128))
    return tile


def gvp_layer_norm(s, v, gamma, beta, *, tile_n=None):
    """
    s: [N, S], v: [N, Vn, 3], gamma/beta: [S].
    Returns (s_out, v_out) with the same shapes/dtypes as the inputs.

    Internally runs in an N-on-lanes layout ([S, N] and [3, Vn, N]); the transposes
    below are layout plumbing — in production keep activations in that layout.
    """
    N, S = s.shape
    Nv, Vn, C3 = v.shape
    assert C3 == 3 and Nv == N

    if tile_n is None:
        tile_n = _pick_tile_n(N, S, Vn)

    s_t = jnp.transpose(s, (1, 0))            # (S, N)
    v_t = jnp.transpose(v, (2, 1, 0))         # (3, Vn, N)
    gamma2 = gamma.reshape(S, 1)
    beta2 = beta.reshape(S, 1)

    grid = (pl.cdiv(N, tile_n),)              # last block padded by Pallas if needed

    s_out_t, v_out_t = pl.pallas_call(
        _gvp_layernorm_kernel,
        out_shape=(
            jax.ShapeDtypeStruct((S, N), s.dtype),
            jax.ShapeDtypeStruct((3, Vn, N), v.dtype),
        ),
        grid_spec=pltpu.PrefetchScalarGridSpec(
            num_scalar_prefetch=0,
            grid=grid,
            in_specs=[
                pl.BlockSpec((S, tile_n), lambda i: (0, i)),
                pl.BlockSpec((3, Vn, tile_n), lambda i: (0, 0, i)),
                pl.BlockSpec((S, 1), lambda i: (0, 0)),
                pl.BlockSpec((S, 1), lambda i: (0, 0)),
            ],
            out_specs=[
                pl.BlockSpec((S, tile_n), lambda i: (0, i)),
                pl.BlockSpec((3, Vn, tile_n), lambda i: (0, 0, i)),
            ],
        ),
        compiler_params=pltpu.CompilerParams(
            dimension_semantics=("parallel",),
            # Explicit scoped-VMEM limit: raises v5e's 16 MiB default, matches the
            # v6e/v7x 32 MiB default, and stays at <=50% of v7x's 64 MiB physical.
            # The tile sizing above keeps live buffers well under this.
            vmem_limit_bytes=32 * 1024 * 1024,
        ),
        # TODO(synk): if a trace still shows exposed DMA at large tiles, add
        # pipeline_mode=pl.Buffered(3) on the s / v in_specs (sweep 2 vs 3).
    )(s_t, v_t, gamma2, beta2)

    s_out = jnp.transpose(s_out_t, (1, 0))
    v_out = jnp.transpose(v_out_t, (2, 1, 0))
    return s_out, v_out


def _reference(s, v, gamma, beta):
    # pure-JAX reference mirroring the PyTorch forward
    s32 = s.astype(jnp.float32)
    mean = jnp.mean(s32, axis=-1, keepdims=True)
    var = jnp.mean((s32 - mean) ** 2, axis=-1, keepdims=True)
    s_out = (s32 - mean) / jnp.sqrt(var + LN_EPS) * gamma + beta

    v32 = v.astype(jnp.float32)
    vn = jnp.sum(v32 * v32, axis=-1, keepdims=True) + GVP_EPS
    mask = (vn > 2 * GVP_EPS).astype(vn.dtype)
    vn = jnp.sum(vn * mask, axis=-2, keepdims=True) / (
        GVP_EPS + jnp.sum(mask, axis=-2, keepdims=True)
    )
    vn = jnp.sqrt(vn + GVP_EPS)
    v_out = mask * (v32 / vn)
    return s_out.astype(s.dtype), v_out.astype(v.dtype)


if __name__ == "__main__":
    key = jax.random.PRNGKey(0)
    k_s, k_v, k_g, k_b = jax.random.split(key, 4)

    batch, seq = 2, 8
    S_DIM, V_DIM = 32, 4          # dims = (scalar_channels, vector_channels)
    N = batch * seq

    # deterministic synthetic inputs / parameters (no checkpoint load)
    s_in = jax.random.normal(k_s, (batch, seq, S_DIM), dtype=jnp.float32)
    v_in = jax.random.normal(k_v, (batch, seq, V_DIM, 3), dtype=jnp.float32)
    # zero out one vector channel in one token to exercise the nonzero_mask path
    v_in = v_in.at[0, 0, 1, :].set(0.0)
    gamma = 1.0 + 0.1 * jax.random.normal(k_g, (S_DIM,), dtype=jnp.float32)
    beta = 0.1 * jax.random.normal(k_b, (S_DIM,), dtype=jnp.float32)

    # flatten leading dims -> module layout [N, S] / [N, Vn, 3]
    s_flat = s_in.reshape(N, S_DIM)
    v_flat = v_in.reshape(N, V_DIM, 3)

    s_out, v_out = gvp_layer_norm(s_flat, v_flat, gamma, beta)
    jax.block_until_ready((s_out, v_out))

    s_ref, v_ref = _reference(s_flat, v_flat, gamma, beta)
    assert jnp.allclose(s_out, s_ref, atol=1e-5, rtol=1e-5)
    assert jnp.allclose(v_out, v_ref, atol=1e-5, rtol=1e-5)

    # restore original (batch, seq, ...) shapes
    s_out = s_out.reshape(batch, seq, S_DIM)
    v_out = v_out.reshape(batch, seq, V_DIM, 3)

    print("KERNEL_OK")
</pallas_src>

<mosaic_0001>
module attributes {stable_mosaic.version = 11 : i64} {
  func.func @_gvp_layernorm_kernel(%arg0: i32, %arg1: memref<32x16xf32, #tpu.memory_space<vmem>>, %arg2: memref<3x4x16xf32, #tpu.memory_space<vmem>>, %arg3: memref<32x1xf32, #tpu.memory_space<vmem>>, %arg4: memref<32x1xf32, #tpu.memory_space<vmem>>, %arg5: memref<32x16xf32, #tpu.memory_space<vmem>>, %arg6: memref<3x4x16xf32, #tpu.memory_space<vmem>>) attributes {dimension_semantics = [#tpu.dimension_semantics<parallel>], iteration_bounds = array<i64: 1>, scalar_prefetch = 0 : i64, scratch_operands = 0 : i64, tpu.core_type = #tpu.core_type<tc>, window_params = [{transform_indices = @transform_0, window_bounds = array<i64: 32, 16>}, {transform_indices = @transform_1, window_bounds = array<i64: 3, 4, 16>}, {pipeline_mode = #tpu.pipeline_mode<synchronous>, transform_indices = @transform_2, window_bounds = array<i64: 32, 1>}, {pipeline_mode = #tpu.pipeline_mode<synchronous>, transform_indices = @transform_3, window_bounds = array<i64: 32, 1>}, {transform_indices = @transform_4, window_bounds = array<i64: 32, 16>}, {transform_indices = @transform_5, window_bounds = array<i64: 3, 4, 16>}]} {
    %c0 = arith.constant 0 : index
    %c0_0 = arith.constant 0 : index
    %0 = vector.load %arg1[%c0, %c0_0] : memref<32x16xf32, #tpu.memory_space<vmem>>, vector<32x16xf32>
    %cst = arith.constant dense<0.000000e+00> : vector<16xf32>
    %1 = vector.multi_reduction <add>, %0, %cst [0] : vector<32x16xf32> to vector<16xf32>
    %2 = vector.shape_cast %1 : vector<16xf32> to vector<1x16xf32>
    %cst_1 = arith.constant 3.200000e+01 : f32
    %3 = vector.broadcast %cst_1 : f32 to vector<1x16xf32>
    %4 = arith.divf %2, %3 : vector<1x16xf32>
    %5 = vector.broadcast %4 : vector<1x16xf32> to vector<32x16xf32>
    %6 = arith.subf %0, %5 : vector<32x16xf32>
    %7 = arith.mulf %6, %6 : vector<32x16xf32>
    %cst_2 = arith.constant dense<0.000000e+00> : vector<16xf32>
    %8 = vector.multi_reduction <add>, %7, %cst_2 [0] : vector<32x16xf32> to vector<16xf32>
    %9 = vector.shape_cast %8 : vector<16xf32> to vector<1x16xf32>
    %cst_3 = arith.constant 3.200000e+01 : f32
    %10 = vector.broadcast %cst_3 : f32 to vector<1x16xf32>
    %11 = arith.divf %9, %10 : vector<1x16xf32>
    %cst_4 = arith.constant 9.99999974E-6 : f32
    %12 = vector.broadcast %cst_4 : f32 to vector<1x16xf32>
    %13 = arith.addf %11, %12 : vector<1x16xf32>
    %14 = math.rsqrt %13 : vector<1x16xf32>
    %15 = vector.broadcast %14 : vector<1x16xf32> to vector<32x16xf32>
    %16 = arith.mulf %6, %15 : vector<32x16xf32>
    %c0_5 = arith.constant 0 : index
    %c0_6 = arith.constant 0 : index
    %17 = vector.load %arg3[%c0_5, %c0_6] : memref<32x1xf32, #tpu.memory_space<vmem>>, vector<32x1xf32>
    %c0_7 = arith.constant 0 : index
    %c0_8 = arith.constant 0 : index
    %18 = vector.load %arg4[%c0_7, %c0_8] : memref<32x1xf32, #tpu.memory_space<vmem>>, vector<32x1xf32>
    %19 = vector.broadcast %17 : vector<32x1xf32> to vector<32x16xf32>
    %20 = arith.mulf %16, %19 : vector<32x16xf32>
    %21 = vector.broadcast %18 : vector<32x1xf32> to vector<32x16xf32>
    %22 = arith.addf %20, %21 : vector<32x16xf32>
    %c0_9 = arith.constant 0 : index
    %c0_10 = arith.constant 0 : index
    %23 = vector.load %arg5[%c0_9, %c0_10] : memref<32x16xf32, #tpu.memory_space<vmem>>, vector<32x16xf32>
    tpu.vector_store %arg5[%c0_9, %c0_10], %22 {strides = array<i32>} : memref<32x16xf32, #tpu.memory_space<vmem>>, vector<32x16xf32>,
    %c0_11 = arith.constant 0 : index
    %c0_12 = arith.constant 0 : index
    %c0_13 = arith.constant 0 : index
    %24 = vector.load %arg2[%c0_11, %c0_12, %c0_13] : memref<3x4x16xf32, #tpu.memory_space<vmem>>, vector<3x4x16xf32>
    %25 = arith.mulf %24, %24 : vector<3x4x16xf32>
    %26 = vector.extract_strided_slice %25 {offsets = [0, 0, 0], sizes = [1, 4, 16], strides = [1, 1, 1]} : vector<3x4x16xf32> to vector<1x4x16xf32>
    %27 = vector.shape_cast %26 : vector<1x4x16xf32> to vector<4x16xf32>
    %28 = vector.extract_strided_slice %25 {offsets = [1, 0, 0], sizes = [1, 4, 16], strides = [1, 1, 1]} : vector<3x4x16xf32> to vector<1x4x16xf32>
    %29 = vector.shape_cast %28 : vector<1x4x16xf32> to vector<4x16xf32>
    %30 = arith.addf %27, %29 : vector<4x16xf32>
    %31 = vector.extract_strided_slice %25 {offsets = [2, 0, 0], sizes = [1, 4, 16], strides = [1, 1, 1]} : vector<3x4x16xf32> to vector<1x4x16xf32>
    %32 = vector.shape_cast %31 : vector<1x4x16xf32> to vector<4x16xf32>
    %33 = arith.addf %30, %32 : vector<4x16xf32>
    %cst_14 = arith.constant 9.99999993E-9 : f32
    %34 = vector.broadcast %cst_14 : f32 to vector<4x16xf32>
    %35 = arith.addf %33, %34 : vector<4x16xf32>
    %cst_15 = arith.constant 2.000000e-08 : f32
    %36 = vector.broadcast %cst_15 : f32 to vector<4x16xf32>
    %37 = arith.cmpf ogt, %35, %36 : vector<4x16xf32>
    %38 = arith.extui %37 : vector<4x16xi1> to vector<4x16xi32>
    %39 = arith.sitofp %38 : vector<4x16xi32> to vector<4x16xf32>
    %40 = arith.mulf %35, %39 : vector<4x16xf32>
    %cst_16 = arith.constant dense<0.000000e+00> : vector<16xf32>
    %41 = vector.multi_reduction <add>, %40, %cst_16 [0] : vector<4x16xf32> to vector<16xf32>
    %42 = vector.shape_cast %41 : vector<16xf32> to vector<1x16xf32>
    %cst_17 = arith.constant dense<0.000000e+00> : vector<16xf32>
    %43 = vector.multi_reduction <add>, %39, %cst_17 [0] : vector<4x16xf32> to vector<16xf32>
    %44 = vector.shape_cast %43 : vector<16xf32> to vector<1x16xf32>
    %cst_18 = arith.constant 9.99999993E-9 : f32
    %45 = vector.broadcast %cst_18 : f32 to vector<1x16xf32>
    %46 = arith.addf %45, %44 : vector<1x16xf32>
    %47 = arith.divf %42, %46 : vector<1x16xf32>
    %cst_19 = arith.constant 9.99999993E-9 : f32
    %48 = vector.broadcast %cst_19 : f32 to vector<1x16xf32>
    %49 = arith.addf %47, %48 : vector<1x16xf32>
    %50 = math.rsqrt %49 : vector<1x16xf32>
    %51 = vector.broadcast %50 : vector<1x16xf32> to vector<4x16xf32>
    %52 = arith.mulf %39, %51 : vector<4x16xf32>
    %53 = vector.shape_cast %52 : vector<4x16xf32> to vector<1x4x16xf32>
    %54 = vector.broadcast %53 : vector<1x4x16xf32> to vector<3x4x16xf32>
    %55 = arith.mulf %24, %54 : vector<3x4x16xf32>
    %c0_20 = arith.constant 0 : index
    %c0_21 = arith.constant 0 : index
    %c0_22 = arith.constant 0 : index
    %56 = vector.load %arg6[%c0_20, %c0_21, %c0_22] : memref<3x4x16xf32, #tpu.memory_space<vmem>>, vector<3x4x16xf32>
    tpu.vector_store %arg6[%c0_20, %c0_21, %c0_22], %55 {strides = array<i32>} : memref<3x4x16xf32, #tpu.memory_space<vmem>>, vector<3x4x16xf32>,
    return
  }
  func.func @transform_0(%arg0: i32) -> (i32, i32) {
    %c0_i32 = arith.constant 0 : i32
    %c0_i32_0 = arith.constant 0 : i32
    return %c0_i32, %arg0 : i32, i32
  }
  func.func @transform_1(%arg0: i32) -> (i32, i32, i32) {
    %c0_i32 = arith.constant 0 : i32
    %c0_i32_0 = arith.constant 0 : i32
    %c0_i32_1 = arith.constant 0 : i32
    return %c0_i32, %c0_i32_0, %arg0 : i32, i32, i32
  }
  func.func @transform_2(%arg0: i32) -> (i32, i32) {
    %c0_i32 = arith.constant 0 : i32
    %c0_i32_0 = arith.constant 0 : i32
    %c0_i32_1 = arith.constant 0 : i32
    return %c0_i32, %c0_i32_0 : i32, i32
  }
  func.func @transform_3(%arg0: i32) -> (i32, i32) {
    %c0_i32 = arith.constant 0 : i32
    %c0_i32_0 = arith.constant 0 : i32
    %c0_i32_1 = arith.constant 0 : i32
    return %c0_i32, %c0_i32_0 : i32, i32
  }
  func.func @transform_4(%arg0: i32) -> (i32, i32) {
    %c0_i32 = arith.constant 0 : i32
    %c0_i32_0 = arith.constant 0 : i32
    return %c0_i32, %arg0 : i32, i32
  }
  func.func @transform_5(%arg0: i32) -> (i32, i32, i32) {
    %c0_i32 = arith.constant 0 : i32
    %c0_i32_0 = arith.constant 0 : i32
    %c0_i32_1 = arith.constant 0 : i32
    return %c0_i32, %c0_i32_0, %arg0 : i32, i32, i32
  }
}

</mosaic_0001>

<bundles_post_ra>
// kernel: tpu_custom_call.1
= control target key start
LH: loop header
LB: loop body
LE: loop exit
PB: predicated region body
PF: predicated region fallthrough
CT: control target
= control target key end

     0   :  { %v271_v2 = vmov 0   ;;  %s424_s0 = inlined_call_operand.vmem [shape: f32[32,16], index: 0, kind: input, shape index: {}]   ;;  %s425_s1 = inlined_call_operand.vmem [shape: f32[3,4,16], index: 1, kind: input, shape index: {}]   ;;  %s426_s2 = inlined_call_operand.vmem [shape: f32[32,1], index: 2, kind: input, shape index: {}]   ;;  %s427_s3 = inlined_call_operand.vmem [shape: f32[32,1], index: 3, kind: input, shape index: {}]   ;;  %s428_s4 = inlined_call_operand.vmem [shape: f32[32,16], index: 4, kind: output, shape index: {0}]   ;;  %s429_s5 = inlined_call_operand.hbm [shape: f32[3,4,16], index: 5, kind: output, shape index: {1}]  }
   0x1   :  { %v85_v0 = vld [vmem:[%s426_s2 + $0x10] sm:$0xff]  ;;  %v83_v1 = vld [vmem:[%s426_s2] sm:$0xff]  ;;  %235 = vset.pattern.permute.xlu1 %v271_v2  ;;  %234 = vset.pattern.permute.xlu0 %v271_v2 }
   0x2   :  { %103 = vperm.xlu1 %235, %v85_v0   ;;  %93 = vperm.xlu0 %234, %v83_v1   ;;  %v87_v3 = vld [vmem:[%s427_s3] sm:$0xff] }
   0x3   :  { %11 = vsyncpa [#allocation3], 0  ;;  %236 = vset.pattern.permute.xlu2 %v271_v2  ;;  %v86_v4 = vld [vmem:[%s426_s2 + $0x18] sm:$0xff]  ;;  %v84_v5 = vld [vmem:[%s426_s2 + $0x8] sm:$0xff]  ;;  %vm24_vm0 = vcmask 130048   ;;  %v272_v18 = vmov 32.0  }
   0x4   :  { %117 = vperm.xlu2 %236, %v87_v3   ;;  %v88_v6 = vld [vmem:[%s427_s3 + $0x8] sm:$0xff]  ;;  %v90_v7 = vld [vmem:[%s427_s3 + $0x18] sm:$0xff]  ;;  %v89_v8 = vld [vmem:[%s427_s3 + $0x10] sm:$0xff]  ;;  %237 = vrcp.f32 %v272_v18  ;;  %v273_v55 = vmov 0.0   ;;  %vm156_vm3 = vcmask 125952   ;;  %s213_s23 = sshll.u32 %s429_s5, 4  ;;  %s214_s23 = int_to_ptr.hbm [resolvable:$true] %s213_s23 }
   0x5   :  { %v20_v9 = vld [vmem:[%s424_s0] sm:$0xff]  ;;  %v21_v10 = vld [vmem:[%s424_s0 + $0x8] sm:$0xff]  ;;  %v22_v13 = vld [vmem:[%s424_s0 + $0x10] sm:$0xff]  ;;  %s275_s5 = smov 64   ;;  %s276_s24 = smov 4  }
   0x6   :  { %v25_v11 = vsel %vm24_vm0, %v20_v9, 0.0  ;;  %v26_v12 = vsel %vm24_vm0, %v21_v10, 0.0  ;;  %v28_v15 = vsel %vm24_vm0, %v22_v13, 0.0  ;;  %v23_v16 = vld [vmem:[%s424_s0 + $0x18] sm:$0xff]  ;;  %v350_v32 = vld [vmem:[%s425_s1] sm:$0xf] }
   0x7   :  { %v27_v14 = vadd.f32 %v26_v12, %v25_v11  ;;  %v30_v19 = vsel %vm24_vm0, %v23_v16, 0.0  ;;  %v355_v33 = vld [vmem:[%s425_s1 + $0x4] sm:$0xf]  ;;  %v146_v35 = vmul.f32 %v350_v32, %v350_v32  ;;  %v364_v38 = vld [vmem:[%s425_s1 + $0x8] sm:$0xf]  ;;  %s274_s1 = smov [#allocation2]  }
   0x8   :  { %v147_v36 = vmul.f32 %v355_v33, %v355_v33  ;;  %v148_v39 = vmul.f32 %v364_v38, %v364_v38  ;;  %s211_s20 = sshll.u32 %s274_s1, 4  ;;  %s212_s20 = int_to_ptr.vmem [resolvable:$true] %s211_s20 }
   0x9   :  { %v29_v17 = vadd.f32 %v28_v15, %v27_v14 }
   0xa   :  { %108 = vperm.xlu1 %235, %v86_v4   ;;  %98 = vperm.xlu0 %234, %v84_v5   ;;  %v238_v22 = vpop.eup %237  ;;  %v149_v40 = vadd.f32 %v147_v36, %v146_v35 }
   0xb   :  { %v31_v20 = vadd.f32 %v30_v19, %v29_v17  ;;  %v39_v24 = vmul.f32 32.0, %v238_v22  ;;  %vm43_vm1 = vweird.f32 %v238_v22 }
   0xc   :  { %122 = vperm.xlu2 %236, %v88_v6   ;;  %v150_v43 = vadd.f32 %v149_v40, %v148_v39 }
   0xd   :  { %v32_v21 = vrot.slane %v31_v20, 4  ;;  %v40_v26 = vsub.f32 1.0, %v39_v24 }
   0xe   :  { %v151_v47 = vadd.f32 1e-08, %v150_v43 }
   0xf   :  { %v33_v23 = vadd.f32 %v32_v21, %v31_v20  ;;  %v41_v28 = vmul.f32 %v238_v22, %v40_v26 }
  0x10   :  { %vm152_vm2 = vcmp.gt.f32.partialorder %v151_v47, 2e-08 }
  0x11   :  { %v34_v25 = vrot.slane %v33_v23, 2  ;;  %v42_v30 = vadd.f32 %v238_v22, %v41_v28  ;;  %v387_v56 = vsel %vm152_vm2, 1.0, %v273_v55 }
  0x12   :  { %132 = vperm.xlu1 %235, %v90_v7   ;;  %127 = vperm.xlu0 %234, %v89_v8   ;;  %v164_v58 = vsel %vm156_vm3, %v387_v56, 0.0  ;;  %v155_v8 = vmul.f32 %v387_v56, %v151_v47 }
  0x13   :  { %v35_v27 = vadd.f32 %v34_v25, %v33_v23  ;;  %v44_v34 = vsel %vm43_vm1, %v238_v22, %v42_v30  ;;  %v165_v60 = vrot.slane %v164_v58, 4 }
  0x15   :  { %v36_v29 = vrot.slane %v35_v27, 1  ;;  %v166_v62 = vadd.f32 %v165_v60, %v164_v58 }
  0x17   :  { %v37_v31 = vadd.f32 %v36_v29, %v35_v27  ;;  %v167_v0 = vrot.slane %v166_v62, 2 }
  0x19   :  { %v45_v37 = vmul.f32 %v44_v34, %v37_v31  ;;  %v168_v2 = vadd.f32 %v167_v0, %v166_v62 }
  0x1b   :  { %v368_v41 = vsub.f32 %v20_v9, %v45_v37  ;;  %v370_v42 = vsub.f32 %v21_v10, %v45_v37  ;;  %v372_v44 = vsub.f32 %v22_v13, %v45_v37  ;;  %v378_v48 = vsub.f32 %v23_v16, %v45_v37 }
  0x1c   :  { %v169_v3 = vrot.slane %v168_v2, 1  ;;  %v157_v10 = vsel %vm156_vm3, %v155_v8, 0.0 }
  0x1d   :  { %v50_v45 = vmul.f32 %v368_v41, %v368_v41  ;;  %v51_v46 = vmul.f32 %v370_v42, %v370_v42  ;;  %v52_v49 = vmul.f32 %v372_v44, %v372_v44  ;;  %v53_v53 = vmul.f32 %v378_v48, %v378_v48 }
  0x1e   :  { %v170_v5 = vadd.f32 %v169_v3, %v168_v2  ;;  %v158_v11 = vrot.slane %v157_v10, 4 }
  0x1f   :  { %v54_v50 = vsel %vm24_vm0, %v50_v45, 0.0  ;;  %v55_v51 = vsel %vm24_vm0, %v51_v46, 0.0  ;;  %v57_v54 = vsel %vm24_vm0, %v52_v49, 0.0  ;;  %v59_v59 = vsel %vm24_vm0, %v53_v53, 0.0 }
  0x20   :  { %v56_v52 = vadd.f32 %v55_v51, %v54_v50  ;;  %v171_v6 = vadd.f32 1e-08, %v170_v5  ;;  %v159_v13 = vadd.f32 %v158_v11, %v157_v10 }
  0x22   :  { %v58_v57 = vadd.f32 %v57_v54, %v56_v52  ;;  %239 = vrcp.f32 %v171_v6  ;;  %v160_v16 = vrot.slane %v159_v13, 2  ;;  %v183_v21 = vand.u32 2147483648, %v171_v6 }
  0x23   :  { %vm177_vm4 = vweird.f32 %v171_v6  ;;  %v181_v24 = vand.u32 2147483647, %v171_v6 }
  0x24   :  { %v60_v61 = vadd.f32 %v59_v59, %v58_v57  ;;  %v161_v18 = vadd.f32 %v160_v16, %v159_v13  ;;  %v184_v25 = vor.u32 1.1754944e-38, %v183_v21 }
  0x25   :  { %vm182_vm7 = vcmp.eq.f32.partialorder %v181_v24, 8.507059e+37 }
  0x26   :  { %v61_v63 = vrot.slane %v60_v61, 4  ;;  %v162_v22 = vrot.slane %v161_v18, 1 }
  0x28   :  { %v62_v1 = vadd.f32 %v61_v63, %v60_v61  ;;  %v240_v12 = vpop.eup %239  ;;  %v163_v26 = vadd.f32 %v162_v22, %v161_v18 }
  0x29   :  { %v173_v14 = vmul.f32 %v240_v12, %v171_v6  ;;  %vm178_vm5 = vweird.f32 %v240_v12 }
  0x2a   :  { %v63_v4 = vrot.slane %v62_v1, 2  ;;  %vm179_vm6 = vmor %vm177_vm4, %vm178_vm5 }
  0x2b   :  { %v174_v17 = vsub.f32 1.0, %v173_v14 }
  0x2c   :  { %v64_v7 = vadd.f32 %v63_v4, %v62_v1 }
  0x2d   :  { %v175_v19 = vmul.f32 %v240_v12, %v174_v17 }
  0x2e   :  { %v65_v9 = vrot.slane %v64_v7, 1 }
  0x2f   :  { %v176_v23 = vadd.f32 %v240_v12, %v175_v19 }
  0x30   :  { %v66_v15 = vadd.f32 %v65_v9, %v64_v7 }
  0x31   :  { %v180_v27 = vsel %vm179_vm6, %v240_v12, %v176_v23 }
  0x32   :  { %v67_v20 = vmul.f32 %v66_v15, %v44_v34  ;;  %v185_v29 = vsel %vm182_vm7, %v184_v25, %v180_v27 }
  0x33   :  { %v186_v30 = vmul.f32 %v185_v29, %v163_v26 }
  0x34   :  { %v68_v28 = vadd.f32 1e-05, %v67_v20 }
  0x35   :  { %v187_v31 = vadd.f32 1e-08, %v186_v30 }
  0x36   :  { %241 = vrsqrt.f32 %v68_v28  ;;  %vm75_vm11 = vweird.f32 %v68_v28 }
  0x37   :  { %243 = vrsqrt.f32 %v187_v31  ;;  %vm194_vm8 = vweird.f32 %v187_v31 }
  0x3c   :  { %v242_v35 = vpop.eup %241 }
  0x3d   :  { %v244_v36 = vpop.eup %243  ;;  %v70_v37 = vmul.f32 %v242_v35, %v68_v28  ;;  %vm76_vm12 = vweird.f32 %v242_v35 }
  0x3e   :  { %v189_v34 = vmul.f32 %v244_v36, %v187_v31  ;;  %vm195_vm9 = vweird.f32 %v244_v36  ;;  %vm77_vm13 = vmor %vm75_vm11, %vm76_vm12 }
  0x3f   :  { %v71_v43 = vmul.f32 %v242_v35, %v70_v37  ;;  %vm196_vm10 = vmor %vm194_vm8, %vm195_vm9 }
  0x40   :  { %v190_v39 = vmul.f32 %v244_v36, %v189_v34 }
  0x41   :  { %v72_v47 = vmul.f32 0.5, %v71_v43 }
  0x42   :  { %v191_v40 = vmul.f32 0.5, %v190_v39 }
  0x43   :  { %v73_v51 = vsub.f32 1.5, %v72_v47 }
  0x44   :  { %v192_v45 = vsub.f32 1.5, %v191_v40 }
  0x45   :  { %v74_v55 = vmul.f32 %v242_v35, %v73_v51 }
  0x46   :  { %v193_v46 = vmul.f32 %v244_v36, %v192_v45 }
  0x48   :  { %v197_v49 = vsel %vm196_vm10, %v244_v36, %v193_v46 }
  0x49   :  { %v198_v50 = vmul.f32 %v387_v56, %v197_v49 }
  0x4b   :  { %v199_v52 = vmul.f32 %v198_v50, %v350_v32  ;;  %v200_v53 = vmul.f32 %v198_v50, %v355_v33  ;;  %v201_v54 = vmul.f32 %v198_v50, %v364_v38  ;;  %v78_v32 = vsel %vm77_vm13, %v242_v35, %v74_v55 }
  0x4c   :  { %v79_v33 = vmul.f32 %v78_v32, %v368_v41  ;;  %v80_v60 = vmul.f32 %v78_v32, %v370_v42  ;;  %v81_v1 = vmul.f32 %v78_v32, %v372_v44  ;;  %v82_v41 = vmul.f32 %v78_v32, %v378_v48 }
  0x4d   :  { %202 = vst.msk [vmem:[#allocation2] sm:$0xf] %vm156_vm3, %v199_v52 }
  0x4e   :  { %203 = vst.msk [vmem:[#allocation2 + $0x4] sm:$0xf] %vm156_vm3, %v200_v53 }
  0x4f   :  { %204 = vst.msk [vmem:[#allocation2 + $0x8] sm:$0xf] %vm156_vm3, %v201_v54 }
  0x50   :  { %219 = dma.vmem_to_hbm [thread:$0]  %s212_s20, 192, %s214_s23, [#allocation3], %s275_s5, %s275_s5, %s276_s24  }
  0x5e   :  { %v118_v56 = vpop.permute.xlu2 %117 }
  0x66   :  { %v123_v0 = vpop.permute.xlu2 %122 }
  0x74   :  { %v104_v38 = vpop.permute.xlu1 %103  ;;  %v94_v57 = vpop.permute.xlu0 %93 }
  0x75   :  { %v111_v58 = vmul.f32 %v94_v57, %v79_v33  ;;  %v113_v3 = vmul.f32 %v104_v38, %v81_v1 }
  0x77   :  { %v135_v59 = vadd.f32 %v118_v56, %v111_v58 }
  0x79   :  { %139 = vst.msk [vmem:[%s428_s4] sm:$0xff] %vm24_vm0, %v135_v59 }
  0x7c   :  { %v109_v61 = vpop.permute.xlu1 %108  ;;  %v99_v62 = vpop.permute.xlu0 %98 }
  0x7d   :  { %v112_v63 = vmul.f32 %v99_v62, %v80_v60  ;;  %v114_v4 = vmul.f32 %v109_v61, %v82_v41 }
  0x7f   :  { %v136_v2 = vadd.f32 %v123_v0, %v112_v63 }
  0x81   :  { %140 = vst.msk [vmem:[%s428_s4 + $0x8] sm:$0xff] %vm24_vm0, %v136_v2 }
  0x84   :  { %v133_v5 = vpop.permute.xlu1 %132  ;;  %v128_v6 = vpop.permute.xlu0 %127 }
  0x85   :  { %v138_v7 = vadd.f32 %v133_v5, %v114_v4  ;;  %v137_v42 = vadd.f32 %v128_v6, %v113_v3 }
  0x87   :  { %142 = vst.msk [vmem:[%s428_s4 + $0x18] sm:$0xff] %vm24_vm0, %v138_v7 }
  0x88   :  { %141 = vst.msk [vmem:[%s428_s4 + $0x10] sm:$0xff] %vm24_vm0, %v137_v42 }
  0x89   :  { %269 = dma.done.wait [#allocation3], 192  }
  0x8a   :  { %270 = vsyncadd [#allocation3], 4294967104 }
  0x8b   :  { %226 = vsyncpa [#allocation3], 1 }

</bundles_post_ra>
